<compile_context>
chip_gen: v7x
topology: tpu7x:2x2x1
jax: 0.10.0
libtpu: 0.0.40
codegen_flags: <defaults>
</compile_context>

<pallas_src>
import jax
import jax.numpy as jnp
from jax import lax
from jax.experimental import pallas as pl
from jax.experimental.pallas import tpu as pltpu


def _reg_head_kernel(x_ref, mask_ref,
                     w1_ref, b1_ref, w2_ref, b2_ref, w3_ref, b3_ref,
                     scale_ref, out_ref):
    # x_ref    : (1, 1, T, Cin)   bf16  features of one (level, batch) tile
    # mask_ref : (1, 1, T, 1)     f32   MaskedConv1D output mask
    # wN_ref   : (3*Cin_or_Fd, CoutN) bf16  conv taps flattened along K (tap0 -> x[t-1])
    # bN_ref   : (1, CoutN)       f32
    # scale_ref: (L,)             f32 in SMEM (per-level learnable Scale())
    # out_ref  : (1, 1, T, 128)   f32   lane-dense; real Cout is sliced by the wrapper
    x = x_ref[0, 0].astype(jnp.float32)      # (T, Cin)
    m = mask_ref[0, 0]                       # (T, 1)
    T = x.shape[0]

    # 0/1 row masks that zero the circularly-wrapped boundary row of the rolls,
    # reproducing the conv's zero padding exactly.
    rows = lax.broadcasted_iota(jnp.int32, (T, 1), 0)
    not_first = (rows > 0).astype(jnp.float32)
    not_last = (rows < T - 1).astype(jnp.float32)

    def taps3(h):
        # h: (T, C) f32 -> (T, 3C) bf16 with columns [h[t-1] | h[t] | h[t+1]]
        # pltpu.roll requires non-negative shifts: shift=1 -> h[t-1]; shift=T-1 -> h[t+1].
        h_prev = pltpu.roll(h, shift=1, axis=0) * not_first      # h_prev[t] = h[t-1], 0 at t=0
        h_next = pltpu.roll(h, shift=T - 1, axis=0) * not_last   # h_next[t] = h[t+1], 0 at t=T-1
        return jnp.concatenate([h_prev, h, h_next], axis=-1).astype(jnp.bfloat16)

    def masked_conv(h, w_ref, b_ref):
        # single MXU matmul with K = 3*C, f32 accumulation
        y = jnp.dot(taps3(h), w_ref[...], preferred_element_type=jnp.float32)
        return (y + b_ref[...]) * m          # MaskedConv1D: (conv + bias) * mask

    # head convs: MaskedConv1D -> Identity (with_ln=False) -> ReLU
    h = jnp.maximum(masked_conv(x, w1_ref, b1_ref), 0.0)
    h = jnp.maximum(masked_conv(h, w2_ref, b2_ref), 0.0)
    # offset head (class-aware): MaskedConv1D -> per-level Scale -> ReLU
    y = masked_conv(h, w3_ref, b3_ref)
    s = scale_ref[pl.program_id(0)]
    out_ref[0, 0] = jnp.maximum(y * s, 0.0)


def reg_head_pallas(fpn_feats, fpn_masks, w1, b1, w2, b2, w3, b3, scales):
    """All FPN levels in one pallas_call.

    fpn_feats: list of (B, T_l, Cin) f32; fpn_masks: list of (B, T_l, 1) f32
    wN: (3, Cin_or_Fd, CoutN) f32, bN: (1, CoutN) f32, scales: (L,) f32
    Returns a tuple of (B, T_l, Cout) f32 per level.
    """
    L = len(fpn_feats)
    B, _, Cin = fpn_feats[0].shape
    Fd = w1.shape[2]
    Cout = w3.shape[2]
    Ts = [int(f.shape[1]) for f in fpn_feats]
    Tmax = -(-max(Ts) // 8) * 8                      # sublane-aligned common length

    def pad_T(a, t):
        return jnp.pad(a, ((0, 0), (0, Tmax - t), (0, 0)))

    # Stack levels (zero-padded along T); bf16 halves the HBM->VMEM traffic for x/weights.
    x_all = jnp.stack([pad_T(f, t) for f, t in zip(fpn_feats, Ts)]).astype(jnp.bfloat16)
    m_all = jnp.stack([pad_T(mk, t) for mk, t in zip(fpn_masks, Ts)]).astype(jnp.float32)

    CP = 128                                          # lane-dense padded output width
    w1f = w1.reshape(3 * Cin, Fd).astype(jnp.bfloat16)
    w2f = w2.reshape(3 * Fd, Fd).astype(jnp.bfloat16)
    w3f = jnp.pad(w3, ((0, 0), (0, 0), (0, CP - Cout))).reshape(3 * Fd, CP).astype(jnp.bfloat16)
    b3p = jnp.pad(b3, ((0, 0), (0, CP - Cout)))

    out = pl.pallas_call(
        _reg_head_kernel,
        out_shape=jax.ShapeDtypeStruct((L, B, Tmax, CP), jnp.float32),
        grid_spec=pltpu.PrefetchScalarGridSpec(
            num_scalar_prefetch=0,
            grid=(L, B),
            in_specs=[
                pl.BlockSpec((1, 1, Tmax, Cin), lambda l, b: (l, b, 0, 0)),   # x (bf16)
                pl.BlockSpec((1, 1, Tmax, 1), lambda l, b: (l, b, 0, 0)),     # mask (f32)
                pl.BlockSpec((3 * Cin, Fd), lambda l, b: (0, 0)),             # w1 flat
                pl.BlockSpec((1, Fd), lambda l, b: (0, 0)),                   # b1
                pl.BlockSpec((3 * Fd, Fd), lambda l, b: (0, 0)),              # w2 flat
                pl.BlockSpec((1, Fd), lambda l, b: (0, 0)),                   # b2
                pl.BlockSpec((3 * Fd, CP), lambda l, b: (0, 0)),              # w3 flat, padded
                pl.BlockSpec((1, CP), lambda l, b: (0, 0)),                   # b3 padded
                pl.BlockSpec(memory_space=pltpu.MemorySpace.SMEM),            # per-level scales
            ],
            out_specs=pl.BlockSpec((1, 1, Tmax, CP), lambda l, b: (l, b, 0, 0)),
        ),
        compiler_params=pltpu.CompilerParams(
            dimension_semantics=("parallel", "parallel")),
    )(x_all, m_all, w1f, b1, w2f, b2, w3f, b3p, scales)

    # Un-pad: keep each level's true T and the real Cout.
    return tuple(out[l, :, :Ts[l], :Cout] for l in range(L))


# ----- pure-JAX f32 reference (mirrors the PyTorch forward) -----
def _ref_masked_conv(x, mask, w, b):
    xp = jnp.pad(x, ((0, 0), (1, 1), (0, 0)))
    y = (jnp.einsum('btc,cd->btd', xp[:, :-2], w[0])
         + jnp.einsum('btc,cd->btd', xp[:, 1:-1], w[1])
         + jnp.einsum('btc,cd->btd', xp[:, 2:], w[2])) + b
    return y * mask


def _ref_level(x, mask, w1, b1, w2, b2, w3, b3, scale):
    h = jax.nn.relu(_ref_masked_conv(x, mask, w1, b1))
    h = jax.nn.relu(_ref_masked_conv(h, mask, w2, b2))
    y = _ref_masked_conv(h, mask, w3, b3)
    return jax.nn.relu(y * scale)


if __name__ == "__main__":
    key = jax.random.PRNGKey(0)

    # module config (small, consistent with __init__)
    B = 2
    input_dim = 32
    feat_dim = 32
    fpn_levels = 2
    Ts = [16, 8]                       # per-level sequence lengths
    num_classes = {"taskA": 4}
    class_aware = {"taskA": True}
    task_id = "taskA"
    out_dim = 2 * num_classes[task_id] if class_aware[task_id] else 2

    keys = jax.random.split(key, 16)

    def conv_w(k, cin, cout, ksz=3):
        # torch Conv1d weight is (cout, cin, k); stored here as (k, cin, cout)
        bound = 1.0 / (cin * ksz) ** 0.5
        return jax.random.uniform(k, (ksz, cin, cout), jnp.float32, -bound, bound)

    def conv_b(k, cin, cout, ksz=3):
        bound = 1.0 / (cin * ksz) ** 0.5
        return jax.random.uniform(k, (1, cout), jnp.float32, -bound, bound)

    w1, b1 = conv_w(keys[0], input_dim, feat_dim), conv_b(keys[1], input_dim, feat_dim)
    w2, b2 = conv_w(keys[2], feat_dim, feat_dim), conv_b(keys[3], feat_dim, feat_dim)
    w3, b3 = conv_w(keys[4], feat_dim, out_dim), conv_b(keys[5], feat_dim, out_dim)
    # Scale() initializes to 1.0; use per-level deterministic values so the path is exercised.
    scales = jnp.array([1.0 + 0.25 * l for l in range(fpn_levels)], jnp.float32)

    fpn_feats, fpn_masks = [], []
    for l, T in enumerate(Ts):
        kf = keys[6 + l]
        x = jax.random.normal(kf, (B, T, input_dim), jnp.float32)
        # valid lengths differ per batch element to exercise masking
        lengths = jnp.array([T, T // 2], dtype=jnp.int32)
        valid = (jnp.arange(T)[None, :] < lengths[:, None]).astype(jnp.float32)[..., None]
        fpn_feats.append(x)
        fpn_masks.append(valid)

    out_offsets = reg_head_pallas(fpn_feats, fpn_masks, w1, b1, w2, b2, w3, b3, scales)
    jax.block_until_ready(out_offsets)

    ok = True
    for l in range(fpn_levels):
        ref = _ref_level(fpn_feats[l], fpn_masks[l], w1, b1, w2, b2, w3, b3, scales[l])
        ok = ok and bool(jnp.allclose(out_offsets[l], ref, rtol=2e-2, atol=2e-2))

    if ok:
        print("KERNEL_OK")
    else:
        print("MISMATCH")
</pallas_src>

<mosaic_0001>
module attributes {stable_mosaic.version = 11 : i64} {
  func.func @_reg_head_kernel(%arg0: i32, %arg1: i32, %arg2: memref<1x1x16x32xbf16, #tpu.memory_space<vmem>>, %arg3: memref<1x1x16x1xf32, #tpu.memory_space<vmem>>, %arg4: memref<96x32xbf16, #tpu.memory_space<vmem>>, %arg5: memref<1x32xf32, #tpu.memory_space<vmem>>, %arg6: memref<96x32xbf16, #tpu.memory_space<vmem>>, %arg7: memref<1x32xf32, #tpu.memory_space<vmem>>, %arg8: memref<96x128xbf16, #tpu.memory_space<vmem>>, %arg9: memref<1x128xf32, #tpu.memory_space<vmem>>, %arg10: memref<2xf32, #tpu.memory_space<smem>>, %arg11: memref<1x1x16x128xf32, #tpu.memory_space<vmem>>) attributes {dimension_semantics = [#tpu.dimension_semantics<parallel>, #tpu.dimension_semantics<parallel>], iteration_bounds = array<i64: 2, 2>, scalar_prefetch = 0 : i64, scratch_operands = 0 : i64, tpu.core_type = #tpu.core_type<tc>, window_params = [{transform_indices = @transform_0, window_bounds = array<i64: 1, 1, 16, 32>}, {transform_indices = @transform_1, window_bounds = array<i64: 1, 1, 16, 1>}, {pipeline_mode = #tpu.pipeline_mode<synchronous>, transform_indices = @transform_2, window_bounds = array<i64: 96, 32>}, {pipeline_mode = #tpu.pipeline_mode<synchronous>, transform_indices = @transform_3, window_bounds = array<i64: 1, 32>}, {pipeline_mode = #tpu.pipeline_mode<synchronous>, transform_indices = @transform_4, window_bounds = array<i64: 96, 32>}, {pipeline_mode = #tpu.pipeline_mode<synchronous>, transform_indices = @transform_5, window_bounds = array<i64: 1, 32>}, {pipeline_mode = #tpu.pipeline_mode<synchronous>, transform_indices = @transform_6, window_bounds = array<i64: 96, 128>}, {pipeline_mode = #tpu.pipeline_mode<synchronous>, transform_indices = @transform_7, window_bounds = array<i64: 1, 128>}, {transform_indices = @transform_8, window_bounds = array<i64: 2>}, {transform_indices = @transform_9, window_bounds = array<i64: 1, 1, 16, 128>}]} {
    %c0 = arith.constant 0 : index
    %c0_0 = arith.constant 0 : index
    %c0_1 = arith.constant 0 : index
    %c0_2 = arith.constant 0 : index
    %0 = vector.load %arg2[%c0, %c0_0, %c0_1, %c0_2] : memref<1x1x16x32xbf16, #tpu.memory_space<vmem>>, vector<1x1x16x32xbf16>
    %1 = vector.shape_cast %0 : vector<1x1x16x32xbf16> to vector<16x32xbf16>
    %2 = arith.extf %1 : vector<16x32xbf16> to vector<16x32xf32>
    %c0_3 = arith.constant 0 : index
    %c0_4 = arith.constant 0 : index
    %c0_5 = arith.constant 0 : index
    %c0_6 = arith.constant 0 : index
    %3 = vector.load %arg3[%c0_3, %c0_4, %c0_5, %c0_6] : memref<1x1x16x1xf32, #tpu.memory_space<vmem>>, vector<1x1x16x1xf32>
    %4 = vector.shape_cast %3 : vector<1x1x16x1xf32> to vector<16x1xf32>
    %5 = tpu.iota {dimensions = array<i32: 0>} : vector<16x1xi32>
    %c0_i32 = arith.constant 0 : i32
    %6 = vector.broadcast %c0_i32 : i32 to vector<16x1xi32>
    %7 = arith.cmpi sgt, %5, %6 : vector<16x1xi32>
    %8 = arith.extui %7 : vector<16x1xi1> to vector<16x1xi32>
    %9 = arith.sitofp %8 : vector<16x1xi32> to vector<16x1xf32>
    %c15_i32 = arith.constant 15 : i32
    %10 = vector.broadcast %c15_i32 : i32 to vector<16x1xi32>
    %11 = arith.cmpi slt, %5, %10 : vector<16x1xi32>
    %12 = arith.extui %11 : vector<16x1xi1> to vector<16x1xi32>
    %13 = arith.sitofp %12 : vector<16x1xi32> to vector<16x1xf32>
    %c1_i32 = arith.constant 1 : i32
    %14 = tpu.dynamic_rotate %2 by %c1_i32 dim 0 : vector<16x32xf32>, i32 -> vector<16x32xf32>
    %15 = vector.broadcast %9 : vector<16x1xf32> to vector<16x32xf32>
    %16 = arith.mulf %14, %15 : vector<16x32xf32>
    %c15_i32_7 = arith.constant 15 : i32
    %17 = tpu.dynamic_rotate %2 by %c15_i32_7 dim 0 : vector<16x32xf32>, i32 -> vector<16x32xf32>
    %18 = vector.broadcast %13 : vector<16x1xf32> to vector<16x32xf32>
    %19 = arith.mulf %17, %18 : vector<16x32xf32>
    %20 = tpu.concatenate %16, %2, %19 in 1 : vector<16x32xf32>, vector<16x32xf32>, vector<16x32xf32> -> vector<16x96xf32>
    %21 = arith.truncf %20 : vector<16x96xf32> to vector<16x96xbf16>
    %c0_8 = arith.constant 0 : index
    %c0_9 = arith.constant 0 : index
    %22 = vector.load %arg4[%c0_8, %c0_9] : memref<96x32xbf16, #tpu.memory_space<vmem>>, vector<96x32xbf16>
    %cst = arith.constant dense<0.000000e+00> : vector<16x32xf32>
    %23 = tpu.matmul %21, %22, %cst {dimension_numbers = #tpu.dot_dimension_numbers<[1], [0], [0], [1], [0, 0, 1, 1], [], []>} : vector<16x96xbf16>, vector<96x32xbf16>, vector<16x32xf32> -> vector<16x32xf32>
    %c0_10 = arith.constant 0 : index
    %c0_11 = arith.constant 0 : index
    %24 = vector.load %arg5[%c0_10, %c0_11] : memref<1x32xf32, #tpu.memory_space<vmem>>, vector<1x32xf32>
    %25 = vector.broadcast %24 : vector<1x32xf32> to vector<16x32xf32>
    %26 = arith.addf %23, %25 : vector<16x32xf32>
    %27 = vector.broadcast %4 : vector<16x1xf32> to vector<16x32xf32>
    %28 = arith.mulf %26, %27 : vector<16x32xf32>
    %cst_12 = arith.constant 0.000000e+00 : f32
    %29 = vector.broadcast %cst_12 : f32 to vector<16x32xf32>
    %30 = arith.maximumf %28, %29 : vector<16x32xf32>
    %c1_i32_13 = arith.constant 1 : i32
    %31 = tpu.dynamic_rotate %30 by %c1_i32_13 dim 0 : vector<16x32xf32>, i32 -> vector<16x32xf32>
    %32 = vector.broadcast %9 : vector<16x1xf32> to vector<16x32xf32>
    %33 = arith.mulf %31, %32 : vector<16x32xf32>
    %c15_i32_14 = arith.constant 15 : i32
    %34 = tpu.dynamic_rotate %30 by %c15_i32_14 dim 0 : vector<16x32xf32>, i32 -> vector<16x32xf32>
    %35 = vector.broadcast %13 : vector<16x1xf32> to vector<16x32xf32>
    %36 = arith.mulf %34, %35 : vector<16x32xf32>
    %37 = tpu.concatenate %33, %30, %36 in 1 : vector<16x32xf32>, vector<16x32xf32>, vector<16x32xf32> -> vector<16x96xf32>
    %38 = arith.truncf %37 : vector<16x96xf32> to vector<16x96xbf16>
    %c0_15 = arith.constant 0 : index
    %c0_16 = arith.constant 0 : index
    %39 = vector.load %arg6[%c0_15, %c0_16] : memref<96x32xbf16, #tpu.memory_space<vmem>>, vector<96x32xbf16>
    %cst_17 = arith.constant dense<0.000000e+00> : vector<16x32xf32>
    %40 = tpu.matmul %38, %39, %cst_17 {dimension_numbers = #tpu.dot_dimension_numbers<[1], [0], [0], [1], [0, 0, 1, 1], [], []>} : vector<16x96xbf16>, vector<96x32xbf16>, vector<16x32xf32> -> vector<16x32xf32>
    %c0_18 = arith.constant 0 : index
    %c0_19 = arith.constant 0 : index
    %41 = vector.load %arg7[%c0_18, %c0_19] : memref<1x32xf32, #tpu.memory_space<vmem>>, vector<1x32xf32>
    %42 = vector.broadcast %41 : vector<1x32xf32> to vector<16x32xf32>
    %43 = arith.addf %40, %42 : vector<16x32xf32>
    %44 = vector.broadcast %4 : vector<16x1xf32> to vector<16x32xf32>
    %45 = arith.mulf %43, %44 : vector<16x32xf32>
    %cst_20 = arith.constant 0.000000e+00 : f32
    %46 = vector.broadcast %cst_20 : f32 to vector<16x32xf32>
    %47 = arith.maximumf %45, %46 : vector<16x32xf32>
    %c1_i32_21 = arith.constant 1 : i32
    %48 = tpu.dynamic_rotate %47 by %c1_i32_21 dim 0 : vector<16x32xf32>, i32 -> vector<16x32xf32>
    %49 = vector.broadcast %9 : vector<16x1xf32> to vector<16x32xf32>
    %50 = arith.mulf %48, %49 : vector<16x32xf32>
    %c15_i32_22 = arith.constant 15 : i32
    %51 = tpu.dynamic_rotate %47 by %c15_i32_22 dim 0 : vector<16x32xf32>, i32 -> vector<16x32xf32>
    %52 = vector.broadcast %13 : vector<16x1xf32> to vector<16x32xf32>
    %53 = arith.mulf %51, %52 : vector<16x32xf32>
    %54 = tpu.concatenate %50, %47, %53 in 1 : vector<16x32xf32>, vector<16x32xf32>, vector<16x32xf32> -> vector<16x96xf32>
    %55 = arith.truncf %54 : vector<16x96xf32> to vector<16x96xbf16>
    %c0_23 = arith.constant 0 : index
    %c0_24 = arith.constant 0 : index
    %56 = vector.load %arg8[%c0_23, %c0_24] : memref<96x128xbf16, #tpu.memory_space<vmem>>, vector<96x128xbf16>
    %cst_25 = arith.constant dense<0.000000e+00> : vector<16x128xf32>
    %57 = tpu.matmul %55, %56, %cst_25 {dimension_numbers = #tpu.dot_dimension_numbers<[1], [0], [0], [1], [0, 0, 1, 1], [], []>} : vector<16x96xbf16>, vector<96x128xbf16>, vector<16x128xf32> -> vector<16x128xf32>
    %c0_26 = arith.constant 0 : index
    %c0_27 = arith.constant 0 : index
    %58 = vector.load %arg9[%c0_26, %c0_27] : memref<1x128xf32, #tpu.memory_space<vmem>>, vector<1x128xf32>
    %59 = vector.broadcast %58 : vector<1x128xf32> to vector<16x128xf32>
    %60 = arith.addf %57, %59 : vector<16x128xf32>
    %61 = vector.broadcast %4 : vector<16x1xf32> to vector<16x128xf32>
    %62 = arith.mulf %60, %61 : vector<16x128xf32>
    %63 = arith.index_cast %arg0 : i32 to index
    %64 = memref.load %arg10[%63] : memref<2xf32, #tpu.memory_space<smem>>
    %65 = vector.broadcast %64 : f32 to vector<16x128xf32>
    %66 = arith.mulf %62, %65 : vector<16x128xf32>
    %cst_28 = arith.constant 0.000000e+00 : f32
    %67 = vector.broadcast %cst_28 : f32 to vector<16x128xf32>
    %68 = arith.maximumf %66, %67 : vector<16x128xf32>
    %c0_29 = arith.constant 0 : index
    %c0_30 = arith.constant 0 : index
    %c0_31 = arith.constant 0 : index
    %c0_32 = arith.constant 0 : index
    %69 = vector.load %arg11[%c0_29, %c0_30, %c0_31, %c0_32] : memref<1x1x16x128xf32, #tpu.memory_space<vmem>>, vector<1x1x16x128xf32>
    %70 = vector.shape_cast %69 : vector<1x1x16x128xf32> to vector<16x128xf32>
    %71 = vector.shape_cast %68 : vector<16x128xf32> to vector<1x1x16x128xf32>
    tpu.vector_store %arg11[%c0_29, %c0_30, %c0_31, %c0_32], %71 {strides = array<i32>} : memref<1x1x16x128xf32, #tpu.memory_space<vmem>>, vector<1x1x16x128xf32>,
    return
  }
  func.func @transform_0(%arg0: i32, %arg1: i32) -> (i32, i32, i32, i32) {
    %c0_i32 = arith.constant 0 : i32
    %c0_i32_0 = arith.constant 0 : i32
    %c0_i32_1 = arith.constant 0 : i32
    return %arg0, %arg1, %c0_i32, %c0_i32_0 : i32, i32, i32, i32
  }
  func.func @transform_1(%arg0: i32, %arg1: i32) -> (i32, i32, i32, i32) {
    %c0_i32 = arith.constant 0 : i32
    %c0_i32_0 = arith.constant 0 : i32
    %c0_i32_1 = arith.constant 0 : i32
    return %arg0, %arg1, %c0_i32, %c0_i32_0 : i32, i32, i32, i32
  }
  func.func @transform_2(%arg0: i32, %arg1: i32) -> (i32, i32) {
    %c0_i32 = arith.constant 0 : i32
    %c0_i32_0 = arith.constant 0 : i32
    %c0_i32_1 = arith.constant 0 : i32
    return %c0_i32, %c0_i32_0 : i32, i32
  }
  func.func @transform_3(%arg0: i32, %arg1: i32) -> (i32, i32) {
    %c0_i32 = arith.constant 0 : i32
    %c0_i32_0 = arith.constant 0 : i32
    %c0_i32_1 = arith.constant 0 : i32
    return %c0_i32, %c0_i32_0 : i32, i32
  }
  func.func @transform_4(%arg0: i32, %arg1: i32) -> (i32, i32) {
    %c0_i32 = arith.constant 0 : i32
    %c0_i32_0 = arith.constant 0 : i32
    %c0_i32_1 = arith.constant 0 : i32
    return %c0_i32, %c0_i32_0 : i32, i32
  }
  func.func @transform_5(%arg0: i32, %arg1: i32) -> (i32, i32) {
    %c0_i32 = arith.constant 0 : i32
    %c0_i32_0 = arith.constant 0 : i32
    %c0_i32_1 = arith.constant 0 : i32
    return %c0_i32, %c0_i32_0 : i32, i32
  }
  func.func @transform_6(%arg0: i32, %arg1: i32) -> (i32, i32) {
    %c0_i32 = arith.constant 0 : i32
    %c0_i32_0 = arith.constant 0 : i32
    %c0_i32_1 = arith.constant 0 : i32
    return %c0_i32, %c0_i32_0 : i32, i32
  }
  func.func @transform_7(%arg0: i32, %arg1: i32) -> (i32, i32) {
    %c0_i32 = arith.constant 0 : i32
    %c0_i32_0 = arith.constant 0 : i32
    %c0_i32_1 = arith.constant 0 : i32
    return %c0_i32, %c0_i32_0 : i32, i32
  }
  func.func @transform_8(%arg0: i32, %arg1: i32) -> i32 {
    %c0_i32 = arith.constant 0 : i32
    %c0_i32_0 = arith.constant 0 : i32
    return %c0_i32 : i32
  }
  func.func @transform_9(%arg0: i32, %arg1: i32) -> (i32, i32, i32, i32) {
    %c0_i32 = arith.constant 0 : i32
    %c0_i32_0 = arith.constant 0 : i32
    %c0_i32_1 = arith.constant 0 : i32
    return %arg0, %arg1, %c0_i32, %c0_i32_0 : i32, i32, i32, i32
  }
}

</mosaic_0001>

<bundles_post_ra>
// kernel: tpu_custom_call.1
= control target key start
LH: loop header
LB: loop body
LE: loop exit
PB: predicated region body
PF: predicated region fallthrough
CT: control target
= control target key end

     0   :  { %s1749_s0 = inlined_call_operand.vmem [shape: bf16[2,2,16,32], index: 0, kind: input, shape index: {}]   ;;  %s1750_s1 = inlined_call_operand.vmem [shape: f32[2,2,16,1], index: 1, kind: input, shape index: {}]   ;;  %s1751_s2 = inlined_call_operand.vmem [shape: bf16[96,32], index: 2, kind: input, shape index: {}]   ;;  %s1752_s3 = inlined_call_operand.vmem [shape: f32[1,32], index: 3, kind: input, shape index: {}]   ;;  %s1753_s4 = inlined_call_operand.vmem [shape: bf16[96,32], index: 4, kind: input, shape index: {}]   ;;  %s1754_s5 = inlined_call_operand.vmem [shape: f32[1,32], index: 5, kind: input, shape index: {}]   ;;  %s1755_s6 = inlined_call_operand.vmem [shape: bf16[96,128], index: 6, kind: input, shape index: {}]   ;;  %s1756_s7 = inlined_call_operand.vmem [shape: f32[1,128], index: 7, kind: input, shape index: {}]   ;;  %s1757_s8 = inlined_call_operand.vmem [shape: f32[2], index: 8, kind: input, shape index: {}]   ;;  %s1758_s9 = inlined_call_operand.hbm [shape: f32[2,2,16,128], index: 9, kind: output, shape index: {}]  }
   0x1   :  { %1762 = sst [smem:[#allocation11_spill]] %s1757_s8 }
   0x2   :  { %14 = vsyncpa [#allocation4], 0 }
   0x3   :  { %15 = vsyncpa [#allocation3], 0 }
   0x4   :  { %17 = vsyncpa [#allocation3 + $0x1], 0  ;;  %s1424_s30 = smov 0   ;;  %s1426_s10 = smov 0  }
   0x5   :  { %s1428_s11 = smov 0   ;;  %s1430_s12 = smov 0  }
   0x6   :  { %s1432_s13 = smov 0   ;;  %s1434_s14 = smov 0  }
   0x7   :  { %s1436_s15 = smov 0   ;;  %s1438_s16 = smov 0  }
   0x8 LB: > { %1763 = sst [smem:[#allocation8_spill]] %s1355_s14  ;;  %s992_s17 = sadd.s32 4294967295, %s1363_s16   ;;  %s1363_s16 = sphi %s1438_s16, %s23_s16   ;;  %s1359_s15 = sphi %s1436_s15, %s1780_s15   ;;  %s1355_s14 = sphi %s1434_s14, %s1779_s14   ;;  %s1351_s13 = sphi %s1432_s13, %s1778_s13   ;;  %s1347_s12 = sphi %s1430_s12, %s1772_s12   ;;  %s1343_s11 = sphi %s1428_s11, %s1777_s11   ;;  %s1339_s10 = sphi %s1426_s10, %s1776_s10   ;;  %s1335_s30 = sphi %s1424_s30, %s1775_s30  }
   0x9   : > { %s993_s18 = sadd.s32 4294967294, %s1363_s16   ;;  %s32_s19 = sadd.s32 1, %s1355_s14 }
   0xa   : > { %s35_s20 = sadd.s32 1, %s1359_s15  ;;  %p33_p0 = scmp.ge.s32.totalorder %s32_s19, 2 }
   0xb   : > { %s247_s21 = sadd.s32 1, %s1343_s11  ;;  %p257_p1 = scmp.ne.s32.totalorder %s1343_s11, %s1339_s10 }
   0xc   : > { %p258_p2 = scmp.eq.s32.totalorder %s992_s17, 3  ;;  %s1782_s19 = smov (%p33_p0, %s32_s19), 0 }
   0xd   : > { %1764 = sst [smem:[#allocation9_spill]] %s1782_s19  ;;  %s1784_s20 = smov (!%p33_p0, %s35_s20), %s1359_s15 }
   0xe   : > { %s243_s22 = ssub.s32 %s1355_s14, %s1782_s19  ;;  %p1476_p3 = por %p258_p2, %p257_p1 }
   0xf   : > { %p37_p4 = scmp.ge.s32.totalorder %s1784_s20, 2  ;;  %p263_p5 = scmp.ne.s32.totalorder %s1339_s10, %s1335_s30 }
  0x10   : > { %p264_p6 = scmp.eq.s32.totalorder %s993_s18, 3  ;;  %p994_p7 = scmp.ge.s32.totalorder %s1363_s16, 1 }
  0x11   : > { %s1786_s20 = smov (%p37_p4, %s1784_s20), 0  ;;  %p271_p9 = scmp.lt.s32.totalorder %s1363_s16, 5 }
  0x12   : > { %1766 = sst [smem:[#allocation10_spill]] %s1786_s20  ;;  %p1485_p8 = por %p264_p6, %p263_p5 }
  0x13   : > { %s242_s25 = ssub.s32 %s1359_s15, %s1786_s20  ;;  %p1492_p10 = pnand %p994_p7, %p271_p9 }
  0x14   : > { %s1767_s24 = scalar_select %p1485_p8, 1, 0 }
  0x15   : > { %s244_s26 = sor.u32 %s243_s22, %s242_s25  ;;  %p1496_p12 = scmp.eq.s32.totalorder %s992_s17, 0 }
  0x16   : > { %p245_p11 = scmp.eq.s32.totalorder %s244_s26, 0  ;;  %p1117_p13 = pneg %p1492_p10 }
  0x17   : > { %s1770_s8 = sld [smem:[#allocation11_spill]] }
  0x18   : > { %s1506_s14 = scalar_select %p245_p11, %s1343_s11, %s247_s21  }
  0x19   : > { %p1118_p0 = pnand %p1496_p12, %p1117_p13 }
  0x1b   : > { %p1252_p2 = pneg %p1118_p0 }
  0x1d   : > { %s302_s19 = sshll.u32 %s1770_s8, 4  ;;  %s303_s19 = int_to_ptr.vmem [resolvable:$true] %s302_s19 }
  0x1e   : > { %s1250_s22 = scalar_lea.vmem %s303_s19, 16  ;;  %p1258_p6 = scmp.lt.s32.totalorder %s303_s19, %s303_s19 }
  0x1f   : > { %p1251_p1 = scmp.ne.s32.totalorder %s303_s19, %s1250_s22  ;;  %p1259_p7 = scmp.lt.s32.totalorder %s1250_s22, %s1250_s22 }
  0x21   : > { %p1253_p4 = pnand %p1252_p2, %p1251_p1  ;;  %p1260_p9 = por %p1259_p7, %p1258_p6 }
  0x23   : > { %p1254_p5 = pneg %p1253_p4 }
  0x25   : > { %p1261_p8 = pnand %p1260_p9, %p1254_p5 }
  0x27   : > { %1264 = shalt.err (!%p1261_p8)
}
  0x28   : > { %s1365_s17 = smov [#allocation2]   ;;  %339 = sbr.rel (%p1492_p10) target bundleno = 1121 (0x461), region = 56 }
  0x29   : > { %1120 = dma.vmem_to_smem (!%p1118_p0), %s303_s19, 16, %s1365_s17, [#allocation4]  }
  0x2f   : > { %1326 = dma.done.wait (%p1496_p12), [#allocation4], 16  }
  0x30   : > { %1328 = vsyncadd (%p1496_p12), [#allocation4], 4294967280 }
  0x31   : > { %345 = sfence }
  0x32   : > { %p389_p11 = scmp.lt.s32.totalorder %s1351_s13, 1  ;;  %p391_p13 = scmp.lt.s32.totalorder %s1347_s12, 1  ;;  %v414_v0 = vlaneseq  ;;  %v1232_v1 = vld [vmem:[%s1751_s2] sm:$0xff]   ;;  %v1366_v2 = vmov 0.0   ;;  %v1233_v4 = vld [vmem:[%s1751_s2 + $0x8] sm:$0xff]   ;;  %v1234_v6 = vld [vmem:[%s1751_s2 + $0x10] sm:$0xff]  }
  0x33   : > { %1063 = vmatprep.subr.bf16.mxu0 %v1366_v2  ;;  %1079 = vmatprep.subr.bf16.mxu1 %v1366_v2  ;;  %v1235_v7 = vld [vmem:[%s1751_s2 + $0x18] sm:$0xff]   ;;  %vm1367_vm3 = vmmov 0   ;;  %v1236_v19 = vld [vmem:[%s1751_s2 + $0x20] sm:$0xff]   ;;  %v1369_v23 = vmov 0   ;;  %v1237_v27 = vld [vmem:[%s1751_s2 + $0x28] sm:$0xff]   ;;  %s1370_s26 = smov 64  }
  0x34   : > { %s390_s19 = scalar_select %p389_p11, %s1351_s13, 1  ;;  %v1524_v3 = vshrl.u32 %v414_v0, 7  ;;  %1064 = vmatpush3.bf16.msra.mxu0 %v1232_v1  ;;  %1075 = vmatprep.mubr.msk.bf16.mxu0 %vm1367_vm3, %v1366_v2  ;;  %vm459_vm5 = vcmask 261120   ;;  %vm462_vm6 = vcmask 523264   ;;  %vm521_vm7 = vcmask 785408   ;;  %v1238_v41 = vld [vmem:[%s1753_s4] sm:$0xff]  }
  0x35   : > { %s392_s28 = scalar_select %p391_p13, %s1347_s12, 1  ;;  %1065 = vmatprep.subr.bf16.mxu0 %v1366_v2  ;;  %1091 = vmatprep.mubr.msk.bf16.mxu1 %vm1367_vm3, %v1366_v2  ;;  %v1239_v42 = vld [vmem:[%s1753_s4 + $0x8] sm:$0xff]   ;;  %v1240_v43 = vld [vmem:[%s1753_s4 + $0x10] sm:$0xff]   ;;  %v1241_v44 = vld [vmem:[%s1753_s4 + $0x18] sm:$0xff]  }
  0x36   : > { %s1001_s29 = sshll.u32 %s390_s19, 2  ;;  %v416_v5 = vadd.s32 8, %v1524_v3  ;;  %vm438_vm1 = vcmp.lt.s32.totalorder %v1524_v3, 7  ;;  %vm431_vm2 = vcmp.lt.s32.totalorder %v1524_v3, 1  ;;  %1210 = vset.pattern.permute.xlu1 %v1369_v23  ;;  %1231 = vset.pattern.permute.xlu0 %v1369_v23  ;;  %vm417_vm4 = vcmp.gt.s32.totalorder %v1524_v3, 0  ;;  %v1242_v47 = vld [vmem:[%s1753_s4 + $0x20] sm:$0xff]  }
  0x37   : > { %s1000_s18 = sshll.u32 %s392_s28, 1  ;;  %v1577_v29 = vsel %vm417_vm4, 1.0, %v1366_v2  ;;  %1080 = vmatpush3.bf16.msra.mxu1 %v1238_v41  ;;  %v1008_v46 = vld [vmem:[%s1752_s3] ss:$0 sm:$0xff]  ;;  %v1243_v55 = vld [vmem:[%s1753_s4 + $0x28] sm:$0xff]   ;;  %s1033_s19 = sshll.u32 %s1347_s12, 1 }
  0x38   : > { %s395_s22 = sadd.s32 %s1001_s29, %s1000_s18  ;;  %1066 = vmatpush3.bf16.msra.mxu0 %v1233_v4  ;;  %vm424_vm0 = vcmp.lt.s32.totalorder %v416_v5, 15  ;;  %s1368_s18 = smov 32   ;;  %1081 = vmatprep.subr.bf16.mxu1 %v1366_v2  ;;  %v1245_v23 = vld [vmem:[%s1755_s6 + $0x8] sm:$0xff]  }
  0x39   : > { %s1002_s25 = sshll.u32 %s395_s22, 2  ;;  %1067 = vmatprep.subr.bf16.mxu0 %v1366_v2  ;;  %v1545_v11 = vsel %vm424_vm0, 1.0, %v1366_v2  ;;  %s1005_s20 = sshll.u32 %s395_s22, 3 }
  0x3a   : > { %s397_s8 = scalar_lea.vmem %s1749_s0, %s1002_s25  ;;  %s406_s29 = scalar_lea.vmem %s1750_s1, %s1005_s20 }
  0x3b   : > { %v1039_v8 = vld [vmem:[%s397_s8] sm:$0xff]   ;;  %v413_v24 = vld [vmem:[%s406_s29 + $0x8] sm:$0xff]  ;;  %1082 = vmatpush3.bf16.msra.mxu1 %v1239_v42  ;;  %s1034_s20 = sshll.u32 %s1351_s13, 2  ;;  %s1371_s25 = smov [#allocation5]  }
  0x3c   : > { %v1040_v9 = vunpack.c.l.bf16 %v1039_v8  ;;  %v1041_v10 = vunpack.c.h.bf16 %v1039_v8  ;;  %1068 = vmatpush3.bf16.msra.mxu0 %v1234_v6  ;;  %v412_v20 = vld [vmem:[%s406_s29] sm:$0xff]  ;;  %1083 = vmatprep.subr.bf16.mxu1 %v1366_v2  ;;  %s871_s8 = sadd.s32 %s1034_s20, %s1033_s19  ;;  %s1269_s27 = sshll.u32 %s1371_s25, 4  ;;  %s1270_s27 = int_to_ptr.vmem [resolvable:$false] %s1269_s27 }
  0x3d   : > { %1069 = vmatprep.subr.bf16.mxu0 %v1366_v2  ;;  %568 = vperm.xlu1 %1210, %v412_v20   ;;  %s1035_s17 = sshll.u32 %s871_s8, 7  ;;  %s1271_s19 = scalar_lea.vmem %s1270_s27, 512 }
  0x3e   : > { %v430_v12 = vrot.slane %v1041_v10, 7  ;;  %v1200_v13 = vpack.i.bf16 %v1041_v10, %v1040_v9  ;;  %v429_v14 = vrot.slane %v1040_v9, 7  ;;  %v436_v15 = vrot.slane %v1040_v9, 1  ;;  %s1693_s22 = scalar_lea.hbm %s1758_s9, %s1035_s17 }
  0x3f   : > { %v437_v16 = vrot.slane %v1041_v10, 1  ;;  %1084 = vmatpush3.bf16.msra.mxu1 %v1240_v43 }
  0x40   : > { %1201 = vrot.lane.b32.xlu0 %v1200_v13, %s1368_s18  ;;  %1070 = vmatpush3.bf16.msra.mxu0 %v1235_v7  ;;  %v432_v17 = vsel %vm431_vm2, %v429_v14, %v430_v12  ;;  %v433_v18 = vsel %vm431_vm2, %v430_v12, %v429_v14 }
  0x41   : > { %v439_v21 = vsel %vm438_vm1, %v436_v15, %v437_v16  ;;  %v440_v22 = vsel %vm438_vm1, %v437_v16, %v436_v15  ;;  %1071 = vmatprep.subr.bf16.mxu0 %v1366_v2  ;;  %573 = vperm.xlu1 %1210, %v413_v24   ;;  %v434_v32 = vmul.f32 %v1577_v29, %v433_v18  ;;  %v1246_v24 = vld [vmem:[%s1755_s6 + $0x10] sm:$0xff]  }
  0x42   : > { %v442_v25 = vmul.f32 %v1545_v11, %v440_v22  ;;  %1085 = vmatprep.subr.bf16.mxu1 %v1366_v2  ;;  %v1244_v22 = vld [vmem:[%s1755_s6] sm:$0xff]  }
  0x43   : > { %1086 = vmatpush3.bf16.msra.mxu1 %v1241_v44 }
  0x44   : > { %v1205_v26 = vpack.i.bf16 %v442_v25, %v439_v21  ;;  %1072 = vmatpush3.bf16.msra.mxu0 %v1236_v19  ;;  %1087 = vmatprep.subr.bf16.mxu1 %v1366_v2  ;;  %v1247_v25 = vld [vmem:[%s1755_s6 + $0x18] sm:$0xff]  }
  0x45   : > { %1073 = vmatprep.subr.bf16.mxu0 %v1366_v2 }
  0x46   : > { %1206 = vrot.lane.b32.xlu0 %v1205_v26, %s1370_s26  ;;  %v1016_v26 = vld [vmem:[%s1754_s5] ss:$0 sm:$0xff] }
  0x47   : > { %1088 = vmatpush3.bf16.msra.mxu1 %v1242_v47 }
  0x48   : > { %1074 = vmatpush3.bf16.msra.mxu0 %v1237_v27  ;;  %1089 = vmatprep.subr.bf16.mxu1 %v1366_v2  ;;  %v1248_v27 = vld [vmem:[%s1755_s6 + $0x20] sm:$0xff]  }
  0x49   : > { %1095 = vmatprep.subr.bf16.mxu0 %v1366_v2 }
  0x4b   : > { %1090 = vmatpush3.bf16.msra.mxu1 %v1243_v55 }
  0xb2   : > { %v1202_v28 = vpop.permute.xlu0 %1201 }
  0xb3   : > { %v1204_v30 = vunpack.i.h.bf16 %v1202_v28  ;;  %v1203_v31 = vunpack.i.l.bf16 %v1202_v28 }
  0xb5   : > { %v460_v36 = vsel %vm459_vm5, %v434_v32, %v1203_v31  ;;  %v461_v37 = vsel %vm459_vm5, %v432_v17, %v1204_v30 }
  0xb8   : > { %v1207_v33 = vpop.permute.xlu0 %1206 }
  0xb9   : > { %v1209_v34 = vunpack.i.h.bf16 %v1207_v33  ;;  %v1208_v35 = vunpack.i.l.bf16 %v1207_v33 }
  0xbb   : > { %v463_v38 = vsel %vm462_vm6, %v460_v36, %v1208_v35  ;;  %v464_v39 = vsel %vm462_vm6, %v461_v37, %v1209_v34  ;;  %v1249_v36 = vld [vmem:[%s1755_s6 + $0x28] sm:$0xff]  }
  0xbc   : > { %v465_v40 = vpack.c.bf16 %v464_v39, %v463_v38  ;;  %v1603_v45 = vpop.permute.xlu1 %568 }
  0xbe   : > { %1076 = vmatmul.mubr.msk.bf16.vlgmr.msra.gmra.mrb[0].mxu0 %vm521_vm7, %v465_v40 }
  0xbf   : > { %1107 = vmatprep.mubr.msk.bf16.mxu0 %vm1367_vm3, %v1366_v2  ;;  %1096 = vmatpush3.bf16.msra.mxu0 %v1244_v22 }
  0xc0   : > { %v1616_v56 = vpop.permute.xlu1 %573  ;;  %1097 = vmatprep.subr.bf16.mxu0 %v1366_v2 }
  0xc3   : > { %1098 = vmatpush3.bf16.msra.mxu0 %v1245_v23 }
  0xc4   : > { %1099 = vmatprep.subr.bf16.mxu0 %v1366_v2 }
  0xc7   : > { %1100 = vmatpush3.bf16.msra.mxu0 %v1246_v24 }
  0xc8   : > { %1101 = vmatprep.subr.bf16.mxu0 %v1366_v2 }
  0xcb   : > { %1102 = vmatpush3.bf16.msra.mxu0 %v1247_v25 }
  0xcc   : > { %1103 = vmatprep.subr.bf16.mxu0 %v1366_v2 }
  0xcf   : > { %1104 = vmatpush3.bf16.msra.mxu0 %v1248_v27 }
  0xd0   : > { %1105 = vmatprep.subr.bf16.mxu0 %v1366_v2 }
  0xd3   : > { %1106 = vmatpush3.bf16.msra.mxu0 %v1249_v36 }
 0x191   : > { %v559_v48 = vpop.f32.mrb[0].mxu0 }
 0x192   : > { %v560_v49 = vadd.f32 %v1008_v46, %v559_v48  ;;  %v1077_v50 = vpop.f32.mrb[1].mxu0 }
 0x193   : > { %v562_v51 = vpop.f32.mrb[2].mxu0 }
 0x194   : > { %v576_v52 = vmul.f32 %v1603_v45, %v560_v49  ;;  %v563_v53 = vadd.f32 %v1008_v46, %v562_v51  ;;  %v1078_v54 = vpop.f32.mrb[3].mxu0 }
 0x196   : > { %v578_v57 = vmax.f32 %v576_v52, 0.0  ;;  %v577_v58 = vmul.f32 %v1616_v56, %v563_v53 }
 0x198   : > { %v579_v59 = vmax.f32 %v577_v58, 0.0  ;;  %v580_v60 = vrot.slane %v578_v57, 7  ;;  %v586_v61 = vrot.slane %v578_v57, 1 }
 0x19a   : > { %v581_v62 = vrot.slane %v579_v59, 7  ;;  %v587_v63 = vrot.slane %v579_v59, 1  ;;  %v1211_v0 = vpack.i.bf16 %v579_v59, %v578_v57 }
 0x19c   : > { %1212 = vrot.lane.b32.xlu0 %v1211_v0, %s1368_s18  ;;  %v588_v1 = vsel %vm438_vm1, %v586_v61, %v587_v63  ;;  %v589_v4 = vsel %vm438_vm1, %v587_v63, %v586_v61  ;;  %v582_v5 = vsel %vm431_vm2, %v580_v60, %v581_v62  ;;  %v583_v6 = vsel %vm431_vm2, %v581_v62, %v580_v60 }
 0x19d   : > { %v591_v7 = vmul.f32 %v1545_v11, %v589_v4  ;;  %v584_v13 = vmul.f32 %v1577_v29, %v583_v6 }
 0x19f   : > { %v1216_v8 = vpack.i.bf16 %v591_v7, %v588_v1 }
 0x1a1   : > { %1217 = vrot.lane.b32.xlu1 %v1216_v8, %s1370_s26 }
 0x20e   : > { %v1213_v9 = vpop.permute.xlu0 %1212 }
 0x20f   : > { %v1215_v10 = vunpack.i.h.bf16 %v1213_v9  ;;  %v1214_v12 = vunpack.i.l.bf16 %v1213_v9 }
 0x211   : > { %v608_v17 = vsel %vm459_vm5, %v584_v13, %v1214_v12  ;;  %v609_v18 = vsel %vm459_vm5, %v582_v5, %v1215_v10 }
 0x213   : > { %v1218_v14 = vpop.permute.xlu1 %1217 }
 0x214   : > { %v1220_v15 = vunpack.i.h.bf16 %v1218_v14  ;;  %v1219_v16 = vunpack.i.l.bf16 %v1218_v14 }
 0x216   : > { %v610_v19 = vsel %vm462_vm6, %v608_v17, %v1219_v16  ;;  %v611_v20 = vsel %vm462_vm6, %v609_v18, %v1220_v15 }
 0x217   : > { %v612_v21 = vpack.c.bf16 %v611_v20, %v610_v19 }
 0x219   : > { %1092 = vmatmul.mubr.msk.bf16.vlgmr.msra.gmra.mrb[0].mxu1 %vm521_vm7, %v612_v21 }
 0x2ec   : > { %v705_v28 = vpop.f32.mrb[0].mxu1 }
 0x2ed   : > { %v706_v30 = vadd.f32 %v1016_v26, %v705_v28  ;;  %v1093_v31 = vpop.f32.mrb[1].mxu1 }
 0x2ee   : > { %v708_v32 = vpop.f32.mrb[2].mxu1 }
 0x2ef   : > { %v712_v33 = vmul.f32 %v706_v30, %v1603_v45  ;;  %v709_v34 = vadd.f32 %v1016_v26, %v708_v32  ;;  %v1094_v35 = vpop.f32.mrb[3].mxu1 }
 0x2f1   : > { %v714_v37 = vmax.f32 %v712_v33, 0.0  ;;  %v713_v38 = vmul.f32 %v709_v34, %v1616_v56 }
 0x2f3   : > { %v715_v39 = vmax.f32 %v713_v38, 0.0  ;;  %v716_v40 = vrot.slane %v714_v37, 7  ;;  %v722_v41 = vrot.slane %v714_v37, 1 }
 0x2f5   : > { %v717_v42 = vrot.slane %v715_v39, 7  ;;  %v723_v43 = vrot.slane %v715_v39, 1  ;;  %v1221_v44 = vpack.i.bf16 %v715_v39, %v714_v37 }
 0x2f7   : > { %1222 = vrot.lane.b32.xlu0 %v1221_v44, %s1368_s18  ;;  %v724_v2 = vsel %vm438_vm1, %v722_v41, %v723_v43  ;;  %v725_v46 = vsel %vm438_vm1, %v723_v43, %v722_v41  ;;  %v718_v47 = vsel %vm431_vm2, %v716_v40, %v717_v42  ;;  %v719_v48 = vsel %vm431_vm2, %v717_v42, %v716_v40  ;;  %s850_s18 = sld [smem:[#allocation2 + %s1351_s13]] }
 0x2f8   : > { %v727_v49 = vmul.f32 %v1545_v11, %v725_v46  ;;  %v720_v54 = vmul.f32 %v1577_v29, %v719_v48  ;;  %v1024_v29 = vld [vmem:[%s1756_s7] ss:$0 sm:$0xff] }
 0x2fa   : > { %v1226_v50 = vpack.i.bf16 %v727_v49, %v724_v2 }
 0x2fc   : > { %1227 = vrot.lane.b32.xlu1 %v1226_v50, %s1370_s26  ;;  %s386_s26 = sand.u32 1, %s1339_s10  }
 0x2fd   : > { %s999_s21 = sshll.u32 %s386_s26, 4  ;;  %v851_v1 = vstv %s850_s18  ;;  %s1697_s18 = scalar_lea.sflag [#allocation3], %s386_s26 }
 0x2fe   : > { %s388_s28 = scalar_lea.vmem [#allocation5], %s999_s21 }
 0x2ff   : > { %s874_s29 = sshll.u32 %s388_s28, 4  ;;  %s1695_s29 = int_to_ptr.vmem [resolvable:$true] %s874_s29 }
 0x300   : > { %s1265_s21 = scalar_lea.vmem %s1695_s29, 256  ;;  %p1272_p0 = scmp.lt.s32.totalorder %s1695_s29, %s1270_s27 }
 0x301   : > { %p1266_p8 = scmp.ne.s32.totalorder %s1695_s29, %s1265_s21  ;;  %p1273_p1 = scmp.lt.s32.totalorder %s1271_s19, %s1265_s21 }
 0x303   : > { %p1267_p10 = pnand %p1266_p8, %p1476_p3  ;;  %p1274_p2 = por %p1273_p1, %p1272_p0 }
 0x305   : > { %p1268_p12 = pneg %p1267_p10 }
 0x307   : > { %p1275_p4 = pnand %p1274_p2, %p1268_p12 }
 0x369   : > { %v1223_v51 = vpop.permute.xlu0 %1222 }
 0x36a   : > { %v1225_v52 = vunpack.i.h.bf16 %v1223_v51  ;;  %v1224_v53 = vunpack.i.l.bf16 %v1223_v51 }
 0x36c   : > { %v744_v3 = vsel %vm459_vm5, %v720_v54, %v1224_v53  ;;  %v745_v59 = vsel %vm459_vm5, %v718_v47, %v1225_v52 }
 0x36e   : > { %v1228_v55 = vpop.permute.xlu1 %1227 }
 0x36f   : > { %v1230_v57 = vunpack.i.h.bf16 %v1228_v55  ;;  %v1229_v58 = vunpack.i.l.bf16 %v1228_v55 }
 0x371   : > { %v746_v11 = vsel %vm462_vm6, %v744_v3, %v1229_v58  ;;  %v747_v60 = vsel %vm462_vm6, %v745_v59, %v1230_v57 }
 0x372   : > { %v748_v61 = vpack.c.bf16 %v747_v60, %v746_v11 }
 0x374   : > { %1108 = vmatmul.mubr.msk.bf16.vlgmr.msra.gmra.mrb[4].mxu0 %vm521_vm7, %v748_v61 }
 0x447   : > { %v841_v62 = vpop.f32.mrb[4].mxu0 }
 0x448   : > { %v842_v63 = vadd.f32 %v1024_v29, %v841_v62  ;;  %v1109_v0 = vpop.f32.mrb[5].mxu0 }
 0x449   : > { %v844_v4 = vpop.f32.mrb[6].mxu0 }
 0x44a   : > { %v848_v5 = vmul.f32 %v842_v63, %v1603_v45  ;;  %v845_v6 = vadd.f32 %v1024_v29, %v844_v4  ;;  %v1110_v7 = vpop.f32.mrb[7].mxu0 }
 0x44c   : > { %v852_v8 = vmul.f32 %v851_v1, %v848_v5  ;;  %v849_v9 = vmul.f32 %v845_v6, %v1616_v56 }
 0x44e   : > { %v854_v10 = vmax.f32 %v852_v8, 0.0  ;;  %v853_v12 = vmul.f32 %v851_v1, %v849_v9 }
 0x450   : > { %856 = vst [vmem:[%s388_s28] sm:$0xff] %v854_v10  ;;  %v855_v45 = vmax.f32 %v853_v12, 0.0 }
 0x452   : > { %857 = vst [vmem:[%s388_s28 + $0x8] sm:$0xff] %v855_v45 }
 0x453   : > { %1278 = shalt.err (!%p1275_p4)
}
 0x454   : > { %s1279_s26 = scalar_lea.hbm %s1693_s22, 256  ;;  %s1283_s28 = scalar_lea.hbm %s1758_s9, 1024 }
 0x455   : > { %p1280_p5 = scmp.ne.s32.totalorder %s1693_s22, %s1279_s26  ;;  %p1284_p9 = scmp.lt.u32.totalorder %s1693_s22, %s1758_s9 }
 0x456   : > { %p1285_p11 = scmp.lt.u32.totalorder %s1283_s28, %s1279_s26  ;;  %p1287_p8 = scmp.lt.u32.totalorder %s1279_s26, %s1693_s22 }
 0x457   : > { %p1281_p6 = pnand %p1280_p5, %p1476_p3 }
 0x458   : > { %p1286_p13 = por %p1285_p11, %p1284_p9 }
 0x459   : > { %p1282_p7 = pneg %p1281_p6 }
 0x45a   : > { %p1288_p10 = por %p1287_p8, %p1286_p13 }
 0x45c   : > { %p1289_p12 = pnand %p1288_p10, %p1282_p7 }
 0x45e   : > { %1292 = shalt.err (!%p1289_p12)
}
 0x45f   : > { %s1372_s13 = smov 128   ;;  %s1373_s21 = smov 8  }
 0x460   : > { %1115 = dma.vmem_to_hbm [thread:$0]  (%p1476_p3), %s1695_s29, 256, %s1693_s22, %s1697_s18, %s1372_s13, %s1372_s13, %s1373_s21  }
 0x461 PF: > { %p1127_p0 = scmp.ge.s32.totalorder %s1363_s16, 2  ;;  %s889_s25 = sand.u32 1, %s1335_s30  }
 0x462   : > { %p1771_p1 = scmp.ne.s32.totalorder %s1767_s24, 0  ;;  %s890_s27 = scalar_lea.sflag [#allocation3], %s889_s25 }
 0x464   : > { %p1122_p2 = pnand %p1127_p0, %p1771_p1 }
 0x466   : > { %1330 = dma.done.wait (!%p1122_p2), %s890_s27, 256  }
 0x467   : > { %1332 = vsyncadd (!%p1122_p2), %s890_s27, 4294967040  ;;  %s23_s16 = sadd.s32 1, %s1363_s16   ;;  %s1772_s12 = sld [smem:[#allocation8_spill]] }
 0x468   : > { %p20_p4 = scmp.ge.s32.totalorder %s23_s16, 6   ;;  %s1773_s23 = sld [smem:[#allocation9_spill]] }
 0x469   : > { %s1774_s29 = sld [smem:[#allocation10_spill]]  ;;  %s1775_s30 = smov %s1339_s10 }
 0x46a   : > { %s1776_s10 = smov %s1343_s11  ;;  %s1777_s11 = smov %s1506_s14 }
 0x46b   : > { %s1778_s13 = smov %s1359_s15  ;;  %22 = sbr.rel (!%p20_p4) target bundleno = 8 (0x8), region = 99 }
 0x46e   : > { %s1779_s14 = smov %s1773_s23 }
 0x46f   : > { %s1780_s15 = smov %s1774_s29 }
 0x472   :  { %895 = vsyncpa [#allocation3], 1 }
 0x473   :  { %897 = vsyncpa [#allocation3 + $0x1], 1 }
 0x474   :  { %898 = vsyncpa [#allocation4], 1 }
 0x475   :  { %900 = vsyncpa [#allocation4 + $0x1], 1 }

</bundles_post_ra>
